<compile_context>
chip_gen: v5e
topology: v5e:2x2
jax: 0.10.0
libtpu: 0.0.40
codegen_flags: <defaults>
</compile_context>

<pallas_src>
import functools

import jax
import jax.numpy as jnp
from jax.experimental import pallas as pl
from jax.experimental.pallas import tpu as pltpu


# -----------------------------------------------------------------------------
# VMEM budget helpers
# -----------------------------------------------------------------------------
_FALLBACK_VMEM_CAP = 64 * 1024 * 1024  # conservative: v7x per-TC capacity


def _vmem_budget_bytes():
    """~75% of physical VMEM (leave headroom for compiler scratch / buffers)."""
    try:
        cap = int(pltpu.get_tpu_info().vmem_capacity_bytes)
    except Exception:  # attribute / query not available -> be conservative
        cap = _FALLBACK_VMEM_CAP
    return int(cap * 3 // 4)


def _pick_tm(m, row_bytes, resident_bytes, budget):
    """Row tile: whole problem when small, else VMEM-budget-driven, 128-aligned."""
    if m <= 256:
        return int(m)  # single row block, full-dim BlockSpec, no padding needed
    avail = max(budget - resident_bytes, 128 * row_bytes)
    tm = (avail // row_bytes // 128) * 128
    tm = int(max(128, min(256, tm)))          # 128/256 keeps the MXU M-dim full
    tm = min(tm, ((m + 127) // 128) * 128)    # don't exceed (rounded-up) M
    return int(tm)


# -----------------------------------------------------------------------------
# Kernels
# -----------------------------------------------------------------------------
def _fused_kernel(x_ref, w_ref, b_ref, o_ref):
    # x: (tm, D) bf16, w: (D, V) bf16, b: (1, V) f32, o: (tm, V)
    logits = jnp.dot(x_ref[...], w_ref[...],
                     preferred_element_type=jnp.float32) + b_ref[...]
    m = jnp.max(logits, axis=-1, keepdims=True)
    shifted = logits - m
    lse = jnp.log(jnp.sum(jnp.exp(shifted), axis=-1, keepdims=True))
    o_ref[...] = (shifted - lse).astype(o_ref.dtype)


def _phase1_kernel(x_ref, w_ref, b_ref, logits_ref, lse_ref, m_sc, l_sc,
                   *, vocab, tv, mask_tail):
    # Online logsumexp over vocab tiles; raw logits are written out per tile.
    j = pl.program_id(1)

    @pl.when(j == 0)
    def _():
        m_sc[...] = jnp.full_like(m_sc, -jnp.inf)
        l_sc[...] = jnp.zeros_like(l_sc)

    logits = jnp.dot(x_ref[...], w_ref[...],
                     preferred_element_type=jnp.float32) + b_ref[...]
    if mask_tail:
        # Ragged last vocab tile: lanes beyond the true vocab must not poison
        # the row-wise max / sum-exp (their writes are masked anyway).
        col = jax.lax.broadcasted_iota(jnp.int32, logits.shape, 1) + j * tv
        logits = jnp.where(col < vocab, logits, -jnp.inf)
    logits_ref[...] = logits

    m_prev = m_sc[...]
    m_new = jnp.maximum(m_prev, jnp.max(logits, axis=-1, keepdims=True))
    l_sc[...] = (l_sc[...] * jnp.exp(m_prev - m_new)
                 + jnp.sum(jnp.exp(logits - m_new), axis=-1, keepdims=True))
    m_sc[...] = m_new

    @pl.when(j == pl.num_programs(1) - 1)
    def _():
        lse_ref[...] = m_sc[...] + jnp.log(l_sc[...])


def _phase2_kernel(logits_ref, lse_ref, o_ref):
    o_ref[...] = (logits_ref[...] - lse_ref[...]).astype(o_ref.dtype)


# -----------------------------------------------------------------------------
# Wrappers
# -----------------------------------------------------------------------------
def prepare_projection_params(weight, bias):
    """One-time parameter prep (hoisted out of the per-call path).

    weight: (vocab, d_model) torch nn.Linear layout -> (d_model, vocab) bf16
    bias:   (vocab,)                                 -> (1, vocab)      f32
    """
    w_t = jnp.asarray(weight).T.astype(jnp.bfloat16)
    b2 = jnp.asarray(bias).astype(jnp.float32).reshape(1, -1)
    return w_t, b2


def projection_log_softmax(x, w_t, b2, *, out_dtype=None, vocab_tile=512,
                           force_tiled=False):
    """log_softmax(x @ W^T + b, axis=-1) with W^T pre-transposed as (D, V)."""
    lead = x.shape[:-1]
    d_model = x.shape[-1]
    vocab = w_t.shape[-1]
    out_dtype = x.dtype if out_dtype is None else jnp.dtype(out_dtype)
    out_bytes = jnp.dtype(out_dtype).itemsize

    m_rows = 1
    for s in lead:
        m_rows *= s
    x2 = x.reshape(m_rows, d_model).astype(jnp.bfloat16)  # bf16 MXU operand

    budget = _vmem_budget_bytes()
    compiler_kwargs = dict(vmem_limit_bytes=budget)

    # --- fused (full-vocab-resident) path: small / moderate vocab ------------
    fused_resident = d_model * vocab * 2 + vocab * 4      # single-buffered W, b
    fused_row_bytes = (2 * d_model * 2                    # x tile (double-buf)
                       + 2 * vocab * out_bytes            # out tile (double-buf)
                       + 3 * vocab * 4)                   # f32 intermediates
    min_tm = m_rows if m_rows <= 256 else 128
    use_fused = (not force_tiled) and (
        fused_resident + min_tm * fused_row_bytes <= budget)

    if use_fused:
        tm = _pick_tm(m_rows, fused_row_bytes, fused_resident, budget)
        grid = (pl.cdiv(m_rows, tm),)   # ragged last row block handled by masking

        def _fused_call(single_buffer_resident):
            pm = ({"pipeline_mode": pl.Buffered(1)}
                  if single_buffer_resident else {})
            return pl.pallas_call(
                _fused_kernel,
                out_shape=jax.ShapeDtypeStruct((m_rows, vocab), out_dtype),
                grid_spec=pltpu.PrefetchScalarGridSpec(
                    num_scalar_prefetch=0,
                    grid=grid,
                    in_specs=[
                        pl.BlockSpec((tm, d_model), lambda i: (i, 0)),
                        pl.BlockSpec((d_model, vocab), lambda i: (0, 0), **pm),
                        pl.BlockSpec((1, vocab), lambda i: (0, 0), **pm),
                    ],
                    out_specs=pl.BlockSpec((tm, vocab), lambda i: (i, 0)),
                ),
                compiler_params=pltpu.CompilerParams(
                    dimension_semantics=("parallel",), **compiler_kwargs),
            )(x2, w_t, b2)

        try:
            out = _fused_call(True)       # single-buffer grid-invariant W / b
        except Exception:
            out = _fused_call(False)      # fallback: default double buffering
        return out.reshape(*lead, vocab)

    # --- vocab-tiled two-phase path: large vocab ------------------------------
    if vocab <= max(vocab_tile, 128):
        tv = vocab
    else:
        tv = max(128, (vocab_tile // 128) * 128)
    mask_tail = (vocab % tv) != 0

    tiled_resident = 2 * d_model * tv * 2 + 2 * tv * 4     # W / b tiles (dbl-buf)
    tiled_row_bytes = 2 * d_model * 2 + 4 * tv * 4 + 16    # x, logits, scratch
    tm = _pick_tm(m_rows, tiled_row_bytes, tiled_resident, budget)
    grid = (pl.cdiv(m_rows, tm), pl.cdiv(vocab, tv))

    kernel1 = functools.partial(_phase1_kernel, vocab=vocab, tv=tv,
                                mask_tail=mask_tail)
    logits, lse = pl.pallas_call(
        kernel1,
        out_shape=(jax.ShapeDtypeStruct((m_rows, vocab), jnp.float32),
                   jax.ShapeDtypeStruct((m_rows, 1), jnp.float32)),
        grid_spec=pltpu.PrefetchScalarGridSpec(
            num_scalar_prefetch=0,
            grid=grid,
            in_specs=[
                pl.BlockSpec((tm, d_model), lambda i, j: (i, 0)),
                pl.BlockSpec((d_model, tv), lambda i, j: (0, j)),
                pl.BlockSpec((1, tv), lambda i, j: (0, j)),
            ],
            out_specs=(
                pl.BlockSpec((tm, tv), lambda i, j: (i, j)),
                pl.BlockSpec((tm, 1), lambda i, j: (i, 0)),
            ),
            scratch_shapes=[pltpu.VMEM((tm, 1), jnp.float32),
                            pltpu.VMEM((tm, 1), jnp.float32)],
        ),
        compiler_params=pltpu.CompilerParams(
            dimension_semantics=("parallel", "arbitrary"), **compiler_kwargs),
    )(x2, w_t, b2)

    out = pl.pallas_call(
        _phase2_kernel,
        out_shape=jax.ShapeDtypeStruct((m_rows, vocab), out_dtype),
        grid_spec=pltpu.PrefetchScalarGridSpec(
            num_scalar_prefetch=0,
            grid=grid,
            in_specs=[
                pl.BlockSpec((tm, tv), lambda i, j: (i, j)),
                pl.BlockSpec((tm, 1), lambda i, j: (i, 0)),
            ],
            out_specs=pl.BlockSpec((tm, tv), lambda i, j: (i, j)),
        ),
        compiler_params=pltpu.CompilerParams(
            dimension_semantics=("parallel", "parallel"), **compiler_kwargs),
    )(logits, lse)
    return out.reshape(*lead, vocab)


# -----------------------------------------------------------------------------
# Main
# -----------------------------------------------------------------------------
if __name__ == "__main__":
    d_model = 32
    vocab_size = 128
    B, S = 2, 8

    key = jax.random.PRNGKey(0)
    kx, kw, kb = jax.random.split(key, 3)

    x = jax.random.normal(kx, (B, S, d_model), dtype=jnp.float32)
    bound = 1.0 / (d_model ** 0.5)   # torch nn.Linear default init range
    weight = jax.random.uniform(kw, (vocab_size, d_model), jnp.float32, -bound, bound)
    bias = jax.random.uniform(kb, (vocab_size,), jnp.float32, -bound, bound)

    # One-time weight prep (transpose + bf16 cast hoisted out of forward).
    w_t, b2 = prepare_projection_params(weight, bias)

    out = projection_log_softmax(x, w_t, b2)
    out = jax.block_until_ready(out)

    ref = jax.nn.log_softmax(jnp.einsum("bsd,vd->bsv", x, weight) + bias, axis=-1)
    assert out.shape == (B, S, vocab_size), out.shape
    # Tolerance accounts for bf16 MXU operands (f32 accumulation).
    assert jnp.allclose(out, ref, atol=2e-2, rtol=2e-2), \
        float(jnp.max(jnp.abs(out - ref)))

    # Also exercise the large-vocab (vocab-tiled, online-logsumexp) path on a
    # small problem, including a ragged last vocab tile (640 = 2*256 + 128).
    vocab2 = 640
    kw2, kb2 = jax.random.split(kb)
    weight2 = jax.random.uniform(kw2, (vocab2, d_model), jnp.float32, -bound, bound)
    bias2 = jax.random.uniform(kb2, (vocab2,), jnp.float32, -bound, bound)
    w_t2, b22 = prepare_projection_params(weight2, bias2)

    out2 = projection_log_softmax(x, w_t2, b22, vocab_tile=256, force_tiled=True)
    out2 = jax.block_until_ready(out2)
    ref2 = jax.nn.log_softmax(jnp.einsum("bsd,vd->bsv", x, weight2) + bias2, axis=-1)
    assert out2.shape == (B, S, vocab2), out2.shape
    assert jnp.allclose(out2, ref2, atol=2e-2, rtol=2e-2), \
        float(jnp.max(jnp.abs(out2 - ref2)))

    print("KERNEL_OK")
</pallas_src>

<mosaic_0001>
module attributes {stable_mosaic.version = 11 : i64} {
  func.func @_fused_kernel(%arg0: i32, %arg1: memref<16x32xbf16, #tpu.memory_space<vmem>>, %arg2: memref<32x128xbf16, #tpu.memory_space<vmem>>, %arg3: memref<1x128xf32, #tpu.memory_space<vmem>>, %arg4: memref<16x128xf32, #tpu.memory_space<vmem>>) attributes {dimension_semantics = [#tpu.dimension_semantics<parallel>], iteration_bounds = array<i64: 1>, scalar_prefetch = 0 : i64, scratch_operands = 0 : i64, tpu.core_type = #tpu.core_type<tc>, window_params = [{transform_indices = @transform_0, window_bounds = array<i64: 16, 32>}, {pipeline_mode = #tpu.pipeline_mode<synchronous>, transform_indices = @transform_1, window_bounds = array<i64: 32, 128>}, {pipeline_mode = #tpu.pipeline_mode<synchronous>, transform_indices = @transform_2, window_bounds = array<i64: 1, 128>}, {transform_indices = @transform_3, window_bounds = array<i64: 16, 128>}]} {
    %c0 = arith.constant 0 : index
    %c0_0 = arith.constant 0 : index
    %0 = vector.load %arg1[%c0, %c0_0] : memref<16x32xbf16, #tpu.memory_space<vmem>>, vector<16x32xbf16>
    %c0_1 = arith.constant 0 : index
    %c0_2 = arith.constant 0 : index
    %1 = vector.load %arg2[%c0_1, %c0_2] : memref<32x128xbf16, #tpu.memory_space<vmem>>, vector<32x128xbf16>
    %cst = arith.constant dense<0.000000e+00> : vector<16x128xf32>
    %2 = tpu.matmul %0, %1, %cst {dimension_numbers = #tpu.dot_dimension_numbers<[1], [0], [0], [1], [0, 0, 1, 1], [], []>} : vector<16x32xbf16>, vector<32x128xbf16>, vector<16x128xf32> -> vector<16x128xf32>
    %c0_3 = arith.constant 0 : index
    %c0_4 = arith.constant 0 : index
    %3 = vector.load %arg3[%c0_3, %c0_4] : memref<1x128xf32, #tpu.memory_space<vmem>>, vector<1x128xf32>
    %4 = vector.broadcast %3 : vector<1x128xf32> to vector<16x128xf32>
    %5 = arith.addf %2, %4 : vector<16x128xf32>
    %cst_5 = arith.constant dense<0xFF800000> : vector<16xf32>
    %6 = vector.multi_reduction <maximumf>, %5, %cst_5 [1] : vector<16x128xf32> to vector<16xf32>
    %7 = vector.shape_cast %6 : vector<16xf32> to vector<16x1xf32>
    %8 = vector.broadcast %7 : vector<16x1xf32> to vector<16x128xf32>
    %9 = arith.subf %5, %8 : vector<16x128xf32>
    %10 = math.exp %9 : vector<16x128xf32>
    %cst_6 = arith.constant dense<0.000000e+00> : vector<16xf32>
    %11 = vector.multi_reduction <add>, %10, %cst_6 [1] : vector<16x128xf32> to vector<16xf32>
    %12 = vector.shape_cast %11 : vector<16xf32> to vector<16x1xf32>
    %13 = math.log %12 : vector<16x1xf32>
    %14 = vector.broadcast %13 : vector<16x1xf32> to vector<16x128xf32>
    %15 = arith.subf %9, %14 : vector<16x128xf32>
    %c0_7 = arith.constant 0 : index
    %c0_8 = arith.constant 0 : index
    %16 = vector.load %arg4[%c0_7, %c0_8] : memref<16x128xf32, #tpu.memory_space<vmem>>, vector<16x128xf32>
    tpu.vector_store %arg4[%c0_7, %c0_8], %15 {strides = array<i32>} : memref<16x128xf32, #tpu.memory_space<vmem>>, vector<16x128xf32>,
    return
  }
  func.func @transform_0(%arg0: i32) -> (i32, i32) {
    %c0_i32 = arith.constant 0 : i32
    %c0_i32_0 = arith.constant 0 : i32
    return %arg0, %c0_i32 : i32, i32
  }
  func.func @transform_1(%arg0: i32) -> (i32, i32) {
    %c0_i32 = arith.constant 0 : i32
    %c0_i32_0 = arith.constant 0 : i32
    %c0_i32_1 = arith.constant 0 : i32
    return %c0_i32, %c0_i32_0 : i32, i32
  }
  func.func @transform_2(%arg0: i32) -> (i32, i32) {
    %c0_i32 = arith.constant 0 : i32
    %c0_i32_0 = arith.constant 0 : i32
    %c0_i32_1 = arith.constant 0 : i32
    return %c0_i32, %c0_i32_0 : i32, i32
  }
  func.func @transform_3(%arg0: i32) -> (i32, i32) {
    %c0_i32 = arith.constant 0 : i32
    %c0_i32_0 = arith.constant 0 : i32
    return %arg0, %c0_i32 : i32, i32
  }
}

module attributes {stable_mosaic.version = 11 : i64} {
  func.func @_fused_kernel(%arg0: i32, %arg1: memref<16x32xbf16, #tpu.memory_space<vmem>>, %arg2: memref<32x128xbf16, #tpu.memory_space<vmem>>, %arg3: memref<1x128xf32, #tpu.memory_space<vmem>>, %arg4: memref<16x128xf32, #tpu.memory_space<vmem>>) attributes {dimension_semantics = [#tpu.dimension_semantics<parallel>], iteration_bounds = array<i64: 1>, scalar_prefetch = 0 : i64, scratch_operands = 0 : i64, tpu.core_type = #tpu.core_type<tc>, window_params = [{transform_indices = @transform_0, window_bounds = array<i64: 16, 32>}, {pipeline_mode = #tpu.pipeline_mode<synchronous>, transform_indices = @transform_1, window_bounds = array<i64: 32, 128>}, {pipeline_mode = #tpu.pipeline_mode<synchronous>, transform_indices = @transform_2, window_bounds = array<i64: 1, 128>}, {transform_indices = @transform_3, window_bounds = array<i64: 16, 128>}]} {
    %c0 = arith.constant 0 : index
    %c0_0 = arith.constant 0 : index
    %0 = vector.load %arg1[%c0, %c0_0] : memref<16x32xbf16, #tpu.memory_space<vmem>>, vector<16x32xbf16>
    %c0_1 = arith.constant 0 : index
    %c0_2 = arith.constant 0 : index
    %1 = vector.load %arg2[%c0_1, %c0_2] : memref<32x128xbf16, #tpu.memory_space<vmem>>, vector<32x128xbf16>
    %cst = arith.constant dense<0.000000e+00> : vector<16x128xf32>
    %2 = tpu.matmul %0, %1, %cst {dimension_numbers = #tpu.dot_dimension_numbers<[1], [0], [0], [1], [0, 0, 1, 1], [], []>} : vector<16x32xbf16>, vector<32x128xbf16>, vector<16x128xf32> -> vector<16x128xf32>
    %c0_3 = arith.constant 0 : index
    %c0_4 = arith.constant 0 : index
    %3 = vector.load %arg3[%c0_3, %c0_4] : memref<1x128xf32, #tpu.memory_space<vmem>>, vector<1x128xf32>
    %4 = vector.broadcast %3 : vector<1x128xf32> to vector<16x128xf32>
    %5 = arith.addf %2, %4 : vector<16x128xf32>
    %cst_5 = arith.constant dense<0xFF800000> : vector<16xf32>
    %6 = vector.multi_reduction <maximumf>, %5, %cst_5 [1] : vector<16x128xf32> to vector<16xf32>
    %7 = vector.shape_cast %6 : vector<16xf32> to vector<16x1xf32>
    %8 = vector.broadcast %7 : vector<16x1xf32> to vector<16x128xf32>
    %9 = arith.subf %5, %8 : vector<16x128xf32>
    %10 = math.exp %9 : vector<16x128xf32>
    %cst_6 = arith.constant dense<0.000000e+00> : vector<16xf32>
    %11 = vector.multi_reduction <add>, %10, %cst_6 [1] : vector<16x128xf32> to vector<16xf32>
    %12 = vector.shape_cast %11 : vector<16xf32> to vector<16x1xf32>
    %13 = math.log %12 : vector<16x1xf32>
    %14 = vector.broadcast %13 : vector<16x1xf32> to vector<16x128xf32>
    %15 = arith.subf %9, %14 : vector<16x128xf32>
    %c0_7 = arith.constant 0 : index
    %c0_8 = arith.constant 0 : index
    %16 = vector.load %arg4[%c0_7, %c0_8] : memref<16x128xf32, #tpu.memory_space<vmem>>, vector<16x128xf32>
    tpu.vector_store %arg4[%c0_7, %c0_8], %15 {strides = array<i32>} : memref<16x128xf32, #tpu.memory_space<vmem>>, vector<16x128xf32>,
    return
  }
  func.func @transform_0(%arg0: i32) -> (i32, i32) {
    %c0_i32 = arith.constant 0 : i32
    %c0_i32_0 = arith.constant 0 : i32
    return %arg0, %c0_i32 : i32, i32
  }
  func.func @transform_1(%arg0: i32) -> (i32, i32) {
    %c0_i32 = arith.constant 0 : i32
    %c0_i32_0 = arith.constant 0 : i32
    %c0_i32_1 = arith.constant 0 : i32
    return %c0_i32, %c0_i32_0 : i32, i32
  }
  func.func @transform_2(%arg0: i32) -> (i32, i32) {
    %c0_i32 = arith.constant 0 : i32
    %c0_i32_0 = arith.constant 0 : i32
    %c0_i32_1 = arith.constant 0 : i32
    return %c0_i32, %c0_i32_0 : i32, i32
  }
  func.func @transform_3(%arg0: i32) -> (i32, i32) {
    %c0_i32 = arith.constant 0 : i32
    %c0_i32_0 = arith.constant 0 : i32
    return %arg0, %c0_i32 : i32, i32
  }
}

</mosaic_0001>

<bundles_post_ra>
// kernel: tpu_custom_call.1
= control target key start
LH: loop header
LB: loop body
LE: loop exit
PB: predicated region body
PF: predicated region fallthrough
CT: control target
= control target key end

     0   :  { %8 = vsyncpa [#allocation3], 0  ;;  %s284_s0 = inlined_call_operand.hbm [shape: bf16[16,32], index: 0, kind: input, shape index: {}]   ;;  %s285_s1 = inlined_call_operand.hbm [shape: bf16[32,128], index: 1, kind: input, shape index: {}]   ;;  %s286_s2 = inlined_call_operand.vmem [shape: f32[1,128], index: 2, kind: input, shape index: {}]   ;;  %s287_s3 = inlined_call_operand.hbm [shape: f32[16,128], index: 3, kind: output, shape index: {}]  }
   0x1   :  { %9 = vsyncpa [#allocation6], 0 }
   0x2   :  { %10 = vsyncpa [#allocation4], 0  ;;  %s15_s14 = sshll.u32 %s284_s0, 4  ;;  %s245_s15 = smov [#allocation2]   ;;  %s16_s14 = int_to_ptr.hbm [resolvable:$true] %s15_s14 }
   0x3   :  { %s17_s16 = sshll.u32 %s245_s15, 4  ;;  %s28_s19 = sshll.u32 %s285_s1, 4  ;;  %s18_s16 = int_to_ptr.vmem [resolvable:$true] %s17_s16  ;;  %s29_s19 = int_to_ptr.hbm [resolvable:$true] %s28_s19 }
   0x4   :  { %s246_s20 = smov 64   ;;  %s247_s21 = smov 4  }
   0x5   :  { %23 = dma.hbm_to_vmem [thread:$0]  %s16_s14, 128, %s18_s16, [#allocation3], %s246_s20, %s246_s20, %s247_s21  }
   0x6   :  { %s248_s22 = smov [#allocation5]  }
   0x7   :  { %s30_s23 = sshll.u32 %s248_s22, 4  ;;  %s31_s23 = int_to_ptr.vmem [resolvable:$true] %s30_s23 }
   0x8   :  { %36 = dma.hbm_to_vmem [thread:$0]  %s29_s19, 256, %s31_s23, [#allocation6], %s246_s20, %s246_s20, %s247_s21  }
   0x9   :  { %239 = dma.done.wait [#allocation3], 128  }
   0xa   :  { %240 = vsyncadd [#allocation3], 4294967168 }
   0xb   :  { %241 = dma.done.wait [#allocation6], 256  }
   0xc   :  { %242 = vsyncadd [#allocation6], 4294967040  ;;  %v150_v0 = vld [vmem:[#allocation5 + $0x8] sm:$0xff]  ;;  %v149_v1 = vld [vmem:[#allocation5] sm:$0xff]  ;;  %vm75_vm0 = vcmask 261120   ;;  %s121_s27 = sshll.u32 %s287_s3, 4  ;;  %s122_s27 = int_to_ptr.hbm [resolvable:$true] %s121_s27 }
   0xd   :  { %85 = vmatpush.bf16.msra.mxu0 %v150_v0  ;;  %v148_v2 = vld [vmem:[#allocation2] sm:$0xff]  ;;  %s250_s28 = smov 128   ;;  %s251_s29 = smov 8  }
   0xe   :  { %v158_v3 = vld [vmem:[%s286_s2] ss:$0 sm:$0xff]  ;;  %s249_s2 = smov [#allocation7]  }
   0xf   :  { %s119_s24 = sshll.u32 %s249_s2, 4  ;;  %s120_s24 = int_to_ptr.vmem [resolvable:$true] %s119_s24 }
  0x11   :  { %86 = vmatpush.bf16.msra.mxu0 %v149_v1 }
  0x14   :  { %147 = vmatmul.msk.bf16.vlgmr.msra.gmra.mxu0 %vm75_vm0, %v148_v2 }
  0x91   :  { %v88_v4 = vpop.f32.mrf.mxu0 }
  0x92   :  { %v89_v5 = vadd.f32 %v158_v3, %v88_v4 }
  0x94   :  { %93 = vmax.xlane.f32.xlu0 %v89_v5 }
  0x99   :  { %v90_v6 = vpop.f32.mrf.mxu0 }
  0x9a   :  { %v91_v7 = vadd.f32 %v158_v3, %v90_v6 }
  0x9c   :  { %95 = vmax.xlane.f32.xlu0 %v91_v7 }
 0x107   :  { %v94_v8 = vpop.xlane.xlu0 %93 }
 0x108   :  { %v97_v9 = vsub.f32 %v89_v5, %v94_v8 }
 0x10a   :  { %v99_v10 = vmul.f32 1.442695, %v97_v9 }
 0x10c   :  { %159 = vpow2.f32 %v99_v10 }
 0x10f   :  { %v96_v11 = vpop.xlane.xlu0 %95 }
 0x110   :  { %v98_v12 = vsub.f32 %v91_v7, %v96_v11 }
 0x112   :  { %v160_v13 = vpop.eup %159  ;;  %v101_v14 = vmul.f32 1.442695, %v98_v12 }
 0x113   :  { %103 = vadd.xlane.f32.xlu1 %v160_v13 }
 0x114   :  { %161 = vpow2.f32 %v101_v14 }
 0x11a   :  { %v162_v15 = vpop.eup %161 }
 0x11b   :  { %105 = vadd.xlane.f32.xlu1 %v162_v15 }
 0x186   :  { %v104_v16 = vpop.xlane.xlu1 %103 }
 0x187   :  { %163 = vlog2.f32 %v104_v16 }
 0x18d   :  { %v164_v17 = vpop.eup %163 }
 0x18e   :  { %v108_v18 = vmul.f32 0.6931472, %v164_v17  ;;  %v106_v19 = vpop.xlane.xlu1 %105 }
 0x18f   :  { %165 = vlog2.f32 %v106_v19 }
 0x190   :  { %v111_v20 = vsub.f32 %v97_v9, %v108_v18 }
 0x192   :  { %113 = vst [vmem:[#allocation7] sm:$0xff] %v111_v20 }
 0x195   :  { %v166_v21 = vpop.eup %165 }
 0x196   :  { %v110_v22 = vmul.f32 0.6931472, %v166_v21 }
 0x198   :  { %v112_v23 = vsub.f32 %v98_v12, %v110_v22 }
 0x19a   :  { %114 = vst [vmem:[#allocation7 + $0x8] sm:$0xff] %v112_v23 }
 0x19b   :  { %127 = dma.vmem_to_hbm [thread:$0]  %s120_s24, 256, %s122_s27, [#allocation4], %s250_s28, %s250_s28, %s251_s29  }
 0x19c   :  { %243 = dma.done.wait [#allocation4], 256  }
 0x19d   :  { %244 = vsyncadd [#allocation4], 4294967040 }
 0x19e   :  { %132 = vsyncpa [#allocation3], 1 }
 0x19f   :  { %133 = vsyncpa [#allocation6], 1 }
 0x1a0   :  { %134 = vsyncpa [#allocation4], 1 }

// kernel: tpu_custom_call.1
= control target key start
LH: loop header
LB: loop body
LE: loop exit
PB: predicated region body
PF: predicated region fallthrough
CT: control target
= control target key end

     0   :  { %8 = vsyncpa [#allocation3], 0  ;;  %s284_s0 = inlined_call_operand.hbm [shape: bf16[16,32], index: 0, kind: input, shape index: {}]   ;;  %s285_s1 = inlined_call_operand.hbm [shape: bf16[32,128], index: 1, kind: input, shape index: {}]   ;;  %s286_s2 = inlined_call_operand.vmem [shape: f32[1,128], index: 2, kind: input, shape index: {}]   ;;  %s287_s3 = inlined_call_operand.hbm [shape: f32[16,128], index: 3, kind: output, shape index: {}]  }
   0x1   :  { %9 = vsyncpa [#allocation6], 0 }
   0x2   :  { %10 = vsyncpa [#allocation4], 0  ;;  %s15_s14 = sshll.u32 %s284_s0, 4  ;;  %s245_s15 = smov [#allocation2]   ;;  %s16_s14 = int_to_ptr.hbm [resolvable:$true] %s15_s14 }
   0x3   :  { %s17_s16 = sshll.u32 %s245_s15, 4  ;;  %s28_s19 = sshll.u32 %s285_s1, 4  ;;  %s18_s16 = int_to_ptr.vmem [resolvable:$true] %s17_s16  ;;  %s29_s19 = int_to_ptr.hbm [resolvable:$true] %s28_s19 }
   0x4   :  { %s246_s20 = smov 64   ;;  %s247_s21 = smov 4  }
   0x5   :  { %23 = dma.hbm_to_vmem [thread:$0]  %s16_s14, 128, %s18_s16, [#allocation3], %s246_s20, %s246_s20, %s247_s21  }
   0x6   :  { %s248_s22 = smov [#allocation5]  }
   0x7   :  { %s30_s23 = sshll.u32 %s248_s22, 4  ;;  %s31_s23 = int_to_ptr.vmem [resolvable:$true] %s30_s23 }
   0x8   :  { %36 = dma.hbm_to_vmem [thread:$0]  %s29_s19, 256, %s31_s23, [#allocation6], %s246_s20, %s246_s20, %s247_s21  }
   0x9   :  { %239 = dma.done.wait [#allocation3], 128  }
   0xa   :  { %240 = vsyncadd [#allocation3], 4294967168 }
   0xb   :  { %241 = dma.done.wait [#allocation6], 256  }
   0xc   :  { %242 = vsyncadd [#allocation6], 4294967040  ;;  %v150_v0 = vld [vmem:[#allocation5 + $0x8] sm:$0xff]  ;;  %v149_v1 = vld [vmem:[#allocation5] sm:$0xff]  ;;  %vm75_vm0 = vcmask 261120   ;;  %s121_s27 = sshll.u32 %s287_s3, 4  ;;  %s122_s27 = int_to_ptr.hbm [resolvable:$true] %s121_s27 }
   0xd   :  { %85 = vmatpush.bf16.msra.mxu0 %v150_v0  ;;  %v148_v2 = vld [vmem:[#allocation2] sm:$0xff]  ;;  %s250_s28 = smov 128   ;;  %s251_s29 = smov 8  }
   0xe   :  { %v158_v3 = vld [vmem:[%s286_s2] ss:$0 sm:$0xff]  ;;  %s249_s2 = smov [#allocation7]  }
   0xf   :  { %s119_s24 = sshll.u32 %s249_s2, 4  ;;  %s120_s24 = int_to_ptr.vmem [resolvable:$true] %s119_s24 }
  0x11   :  { %86 = vmatpush.bf16.msra.mxu0 %v149_v1 }
  0x14   :  { %147 = vmatmul.msk.bf16.vlgmr.msra.gmra.mxu0 %vm75_vm0, %v148_v2 }
  0x91   :  { %v88_v4 = vpop.f32.mrf.mxu0 }
  0x92   :  { %v89_v5 = vadd.f32 %v158_v3, %v88_v4 }
  0x94   :  { %93 = vmax.xlane.f32.xlu0 %v89_v5 }
  0x99   :  { %v90_v6 = vpop.f32.mrf.mxu0 }
  0x9a   :  { %v91_v7 = vadd.f32 %v158_v3, %v90_v6 }
  0x9c   :  { %95 = vmax.xlane.f32.xlu0 %v91_v7 }
 0x107   :  { %v94_v8 = vpop.xlane.xlu0 %93 }
 0x108   :  { %v97_v9 = vsub.f32 %v89_v5, %v94_v8 }
 0x10a   :  { %v99_v10 = vmul.f32 1.442695, %v97_v9 }
 0x10c   :  { %159 = vpow2.f32 %v99_v10 }
 0x10f   :  { %v96_v11 = vpop.xlane.xlu0 %95 }
 0x110   :  { %v98_v12 = vsub.f32 %v91_v7, %v96_v11 }
 0x112   :  { %v160_v13 = vpop.eup %159  ;;  %v101_v14 = vmul.f32 1.442695, %v98_v12 }
 0x113   :  { %103 = vadd.xlane.f32.xlu1 %v160_v13 }
 0x114   :  { %161 = vpow2.f32 %v101_v14 }
 0x11a   :  { %v162_v15 = vpop.eup %161 }
 0x11b   :  { %105 = vadd.xlane.f32.xlu1 %v162_v15 }
 0x186   :  { %v104_v16 = vpop.xlane.xlu1 %103 }
 0x187   :  { %163 = vlog2.f32 %v104_v16 }
 0x18d   :  { %v164_v17 = vpop.eup %163 }
 0x18e   :  { %v108_v18 = vmul.f32 0.6931472, %v164_v17  ;;  %v106_v19 = vpop.xlane.xlu1 %105 }
 0x18f   :  { %165 = vlog2.f32 %v106_v19 }
 0x190   :  { %v111_v20 = vsub.f32 %v97_v9, %v108_v18 }
 0x192   :  { %113 = vst [vmem:[#allocation7] sm:$0xff] %v111_v20 }
 0x195   :  { %v166_v21 = vpop.eup %165 }
 0x196   :  { %v110_v22 = vmul.f32 0.6931472, %v166_v21 }
 0x198   :  { %v112_v23 = vsub.f32 %v98_v12, %v110_v22 }
 0x19a   :  { %114 = vst [vmem:[#allocation7 + $0x8] sm:$0xff] %v112_v23 }
 0x19b   :  { %127 = dma.vmem_to_hbm [thread:$0]  %s120_s24, 256, %s122_s27, [#allocation4], %s250_s28, %s250_s28, %s251_s29  }
 0x19c   :  { %243 = dma.done.wait [#allocation4], 256  }
 0x19d   :  { %244 = vsyncadd [#allocation4], 4294967040 }
 0x19e   :  { %132 = vsyncpa [#allocation3], 1 }
 0x19f   :  { %133 = vsyncpa [#allocation6], 1 }
 0x1a0   :  { %134 = vsyncpa [#allocation4], 1 }

</bundles_post_ra>
